<compile_context>
chip_gen: v7x
topology: tpu7x:2x2x1
jax: 0.10.0
libtpu: 0.0.40
codegen_flags: <defaults>
</compile_context>

<pallas_src>
import functools

import jax
import jax.numpy as jnp
from jax import lax
from jax.experimental import pallas as pl
from jax.experimental.pallas import tpu as pltpu


def _pool_branch_kernel(x_ref, w_ref, affine_ref, o_ref, *, H, W, TH, avg_pool):
    # x_ref:      (1, H, W, C)      full (unpadded) NHWC image for this batch elem
    # w_ref:      (C, Cout_p)       1x1 conv weight, Cout padded to 128 lanes
    # affine_ref: (2, Cout_p)       row 0: folded scale (incl. 1/9 for avg);
    #                               row 1: folded shift (BN beta + bias term)
    # o_ref:      (1, TH*W, Cout_p) lane-dense output slab for this H tile
    h = pl.program_id(1)
    n_h = H // TH                                   # static
    row0 = pl.multiple_of(h * TH, TH)
    pad = jnp.float32(0.0) if avg_pool else jnp.float32(-jnp.inf)

    center = x_ref[0, pl.ds(row0, TH)].astype(jnp.float32)           # (TH, W, C)
    C = center.shape[-1]

    # ---- halo rows (in-kernel; no wrapper pad) ----
    if n_h == 1:
        # Whole image in one tile: halo rows are pure padding (trace-time path).
        top = jnp.full((W, C), pad, jnp.float32)
        bot = jnp.full((W, C), pad, jnp.float32)
    else:
        top = x_ref[0, jnp.maximum(row0 - 1, 0)].astype(jnp.float32)  # (W, C)
        bot = x_ref[0, jnp.minimum(row0 + TH, H - 1)].astype(jnp.float32)
        top = jnp.where(h == 0, pad, top)
        bot = jnp.where(h == n_h - 1, pad, bot)

    def comb2(a, b):
        return (a + b) if avg_pool else jnp.maximum(a, b)

    def comb3(a, b, c):
        return (a + b + c) if avg_pool else jnp.maximum(jnp.maximum(a, b), c)

    # ---- separable 3x3 pool: H direction (leading-axis shifts, cheap) ----
    if TH == 1:
        up, down = top[None], bot[None]
    else:
        up = jnp.concatenate([top[None], center[:TH - 1]], axis=0)    # row i-1
        down = jnp.concatenate([center[1:], bot[None]], axis=0)       # row i+1
    hsum = comb3(up, center, down)                                    # (TH, W, C)

    # ---- W direction: XLU rolls + edge-column fixup (no misaligned copies) ----
    if W == 1:
        pooled = hsum
    elif W % 8 == 0:
        # Rolls give {left neighbor, right neighbor} in some order; the combine
        # is commutative, so interior columns are exact regardless of roll
        # direction.  Only columns 0 and W-1 (circular wrap) need fixing.
        r1 = pltpu.roll(hsum, 1, axis=1)
        r2 = pltpu.roll(hsum, W - 1, axis=1)
        full = comb3(hsum, r1, r2)
        edge_lo = comb2(hsum[:, 0:1, :], hsum[:, 1:2, :])
        edge_hi = comb2(hsum[:, W - 2:W - 1, :], hsum[:, W - 1:W, :])
        col = lax.broadcasted_iota(jnp.int32, (TH, W, C), 1)
        pooled = jnp.where(col == 0, edge_lo,
                           jnp.where(col == W - 1, edge_hi, full))
    else:
        # Fallback for sublane-unaligned W: shifted slices (one retile copy each).
        padc = jnp.full((TH, 1, C), pad, jnp.float32)
        left = jnp.concatenate([padc, hsum[:, :W - 1, :]], axis=1)
        right = jnp.concatenate([hsum[:, 1:, :], padc], axis=1)
        pooled = comb3(hsum, left, right)

    # NOTE: for avg pooling the 1/9 (count_include_pad=True) is folded into the
    # affine scale in the wrapper, so no divide happens here.

    # ---- 1x1 conv (MXU) + folded affine (BN + bias [+ 1/9]) + ReLU ----
    p2 = pooled.reshape(TH * W, C)
    y = jnp.dot(p2, w_ref[...].astype(jnp.float32),
                preferred_element_type=jnp.float32)
    aff = affine_ref[...]                                             # (2, Cout_p)
    y = y * aff[0:1, :] + aff[1:2, :]
    o_ref[0] = jnp.maximum(y, 0.0).astype(o_ref.dtype)


def _pick_tile_h(H, W, C, Cout_p):
    """Largest divisor of H whose per-step f32 working set stays small, with the
    output slab second-minor (TH*W) sublane-aligned (or TH == H)."""
    budget = 2 * 1024 * 1024
    valid = [d for d in range(1, H + 1)
             if H % d == 0 and (d == H or (d * W) % 8 == 0)]
    within = [d for d in valid if d * W * max(C, Cout_p) * 4 <= budget]
    return max(within) if within else min(valid)


def inception_pool_branch(x_nchw, conv_weight, conv_bias, bn_gamma, bn_beta,
                          bn_mean, bn_var, *, avg_pool=True, use_bn=True,
                          eps=1e-5, tile_h=None, io_dtype=jnp.float32):
    """x_nchw: (N, Cin, H, W).  conv_weight: (Cout, Cin, 1, 1)."""
    N, C, H, W = x_nchw.shape
    Cout = conv_weight.shape[0]
    Cout_p = ((Cout + 127) // 128) * 128            # lane-dense output slab

    # NCHW -> NHWC (channels on the lane axis; realistic Inception pool branches
    # have C >= 128).  No halo pad: handled in-kernel.
    x = jnp.transpose(x_nchw, (0, 2, 3, 1)).astype(io_dtype)

    if (tile_h is None or H % tile_h != 0
            or (tile_h != H and (tile_h * W) % 8 != 0)):
        tile_h = _pick_tile_h(H, W, C, Cout_p)
    TH = tile_h
    n_h = H // TH

    # 1x1 conv weight as a (C, Cout_p) matmul operand (zero-padded lanes).
    w = jnp.transpose(conv_weight.reshape(Cout, C), (1, 0)).astype(io_dtype)
    w = jnp.pad(w, ((0, 0), (0, Cout_p - Cout)))

    # Fold conv bias + eval-mode BatchNorm (+ avg 1/9 divisor) into one
    # per-channel scale/shift pair.
    conv_bias = jnp.asarray(conv_bias, jnp.float32)
    if use_bn:
        scale = bn_gamma.astype(jnp.float32) / jnp.sqrt(bn_var.astype(jnp.float32) + eps)
        shift = bn_beta.astype(jnp.float32) + (conv_bias - bn_mean.astype(jnp.float32)) * scale
    else:
        scale = jnp.ones((Cout,), jnp.float32)
        shift = conv_bias
    if avg_pool:
        scale = scale * jnp.float32(1.0 / 9.0)      # count_include_pad=True -> /9 always
    scale = jnp.pad(scale, (0, Cout_p - Cout))
    shift = jnp.pad(shift, (0, Cout_p - Cout))
    affine = jnp.stack([scale, shift], axis=0).astype(jnp.float32)   # (2, Cout_p)

    kernel = functools.partial(_pool_branch_kernel, H=H, W=W, TH=TH,
                               avg_pool=avg_pool)

    itemsize = jnp.dtype(io_dtype).itemsize
    in_block = H * W * C * itemsize
    out_block = TH * W * Cout_p * 4
    interm = 8 * TH * W * max(C, Cout_p) * 4
    need = 2 * in_block + 2 * out_block + 2 * (C * Cout_p * itemsize) + interm
    vmem_limit = int(min(48 * 2**20, max(4 * 2**20, 2 * need)))

    cost = pl.CostEstimate(
        flops=2 * N * H * W * C * Cout_p + 4 * N * H * W * C,
        transcendentals=0,
        bytes_accessed=int(x.size) * itemsize + N * H * W * Cout_p * 4
                       + int(w.size) * itemsize)

    out_p = pl.pallas_call(
        kernel,
        out_shape=jax.ShapeDtypeStruct((N, H * W, Cout_p), jnp.float32),
        grid_spec=pltpu.PrefetchScalarGridSpec(
            num_scalar_prefetch=0,
            grid=(N, n_h),
            in_specs=[
                pl.BlockSpec((1, H, W, C), lambda n, h: (n, 0, 0, 0)),
                pl.BlockSpec((C, Cout_p), lambda n, h: (0, 0)),
                pl.BlockSpec((2, Cout_p), lambda n, h: (0, 0)),
            ],
            out_specs=pl.BlockSpec((1, TH * W, Cout_p), lambda n, h: (n, h, 0)),
        ),
        compiler_params=pltpu.CompilerParams(
            dimension_semantics=("parallel", "parallel"),
            vmem_limit_bytes=vmem_limit),
        cost_estimate=cost,
    )(x, w, affine)

    out = out_p[:, :, :Cout].reshape(N, H, W, Cout)
    return jnp.transpose(out, (0, 3, 1, 2))         # NHWC -> NCHW


def _reference(x_nchw, conv_weight, conv_bias, bn_gamma, bn_beta, bn_mean,
               bn_var, *, avg_pool=True, use_bn=True, eps=1e-5):
    """Pure-JAX reference (mirrors PyTorch eval-mode semantics)."""
    x = jnp.transpose(x_nchw, (0, 2, 3, 1)).astype(jnp.float32)
    N, H, W, C = x.shape
    Cout = conv_weight.shape[0]
    pad_val = 0.0 if avg_pool else -jnp.inf
    xp = jnp.pad(x, ((0, 0), (1, 1), (1, 1), (0, 0)), constant_values=pad_val)
    if avg_pool:
        pooled = sum(xp[:, dh:dh + H, dw:dw + W, :]
                     for dh in range(3) for dw in range(3)) / 9.0
    else:
        pooled = xp[:, 0:H, 0:W, :]
        for dh in range(3):
            for dw in range(3):
                pooled = jnp.maximum(pooled, xp[:, dh:dh + H, dw:dw + W, :])
    w = jnp.transpose(conv_weight.reshape(Cout, C), (1, 0)).astype(jnp.float32)
    y = jnp.einsum('nhwc,co->nhwo', pooled, w) + conv_bias
    if use_bn:
        y = (y - bn_mean) / jnp.sqrt(bn_var + eps) * bn_gamma + bn_beta
    y = jnp.maximum(y, 0.0)
    return jnp.transpose(y, (0, 3, 1, 2))


if __name__ == "__main__":
    # Small shapes consistent with the module: batch=2, in_channels=4, 16x16, out_channels=8.
    N, Cin, H, W, Cout = 2, 4, 16, 16, 8

    key = jax.random.PRNGKey(0)
    kx, kw, kb2, kg, kb, km, kv = jax.random.split(key, 7)

    x = jax.random.normal(kx, (N, Cin, H, W), jnp.float32)
    conv_weight = jax.random.normal(kw, (Cout, Cin, 1, 1), jnp.float32) * 0.1
    conv_bias = 0.1 * jax.random.normal(kb2, (Cout,), jnp.float32)
    zero_bias = jnp.zeros((Cout,), jnp.float32)      # bias=False case
    bn_gamma = 1.0 + 0.1 * jax.random.normal(kg, (Cout,), jnp.float32)
    bn_beta = 0.1 * jax.random.normal(kb, (Cout,), jnp.float32)
    bn_mean = 0.1 * jax.random.normal(km, (Cout,), jnp.float32)
    bn_var = 0.5 + jnp.abs(jax.random.normal(kv, (Cout,), jnp.float32))

    # Config A: BN-Inception default (avg pool, bias=False, use_bn=True).
    # tile_h=8 -> 2 H-tiles per image, exercising both halo boundary paths.
    out_a = inception_pool_branch(x, conv_weight, zero_bias, bn_gamma, bn_beta,
                                  bn_mean, bn_var, avg_pool=True, use_bn=True,
                                  tile_h=8)
    out_a = jax.block_until_ready(out_a)
    ref_a = _reference(x, conv_weight, zero_bias, bn_gamma, bn_beta, bn_mean,
                       bn_var, avg_pool=True, use_bn=True)
    assert out_a.shape == (N, Cout, H, W)
    assert jnp.allclose(out_a, ref_a, atol=1e-4, rtol=1e-4), "avg-pool mismatch"

    # Config B: max pool, bias=True, no BN.
    out_b = inception_pool_branch(x, conv_weight, conv_bias, bn_gamma, bn_beta,
                                  bn_mean, bn_var, avg_pool=False, use_bn=False,
                                  tile_h=8)
    out_b = jax.block_until_ready(out_b)
    ref_b = _reference(x, conv_weight, conv_bias, bn_gamma, bn_beta, bn_mean,
                       bn_var, avg_pool=False, use_bn=False)
    assert jnp.allclose(out_b, ref_b, atol=1e-4, rtol=1e-4), "max-pool mismatch"

    # Config C: whole image in one H tile (n_h == 1 fast path), avg pool + BN.
    out_c = inception_pool_branch(x, conv_weight, zero_bias, bn_gamma, bn_beta,
                                  bn_mean, bn_var, avg_pool=True, use_bn=True,
                                  tile_h=H)
    out_c = jax.block_until_ready(out_c)
    assert jnp.allclose(out_c, ref_a, atol=1e-4, rtol=1e-4), "single-tile mismatch"

    print("KERNEL_OK")
</pallas_src>

<mosaic_0001>
module attributes {stable_mosaic.version = 11 : i64} {
  func.func @_pool_branch_kernel(%arg0: i32, %arg1: i32, %arg2: memref<1x16x16x4xf32, #tpu.memory_space<vmem>>, %arg3: memref<4x128xf32, #tpu.memory_space<vmem>>, %arg4: memref<2x128xf32, #tpu.memory_space<vmem>>, %arg5: memref<1x128x128xf32, #tpu.memory_space<vmem>>) attributes {dimension_semantics = [#tpu.dimension_semantics<parallel>, #tpu.dimension_semantics<parallel>], iteration_bounds = array<i64: 2, 2>, scalar_prefetch = 0 : i64, scratch_operands = 0 : i64, tpu.core_type = #tpu.core_type<tc>, window_params = [{transform_indices = @transform_0, window_bounds = array<i64: 1, 16, 16, 4>}, {pipeline_mode = #tpu.pipeline_mode<synchronous>, transform_indices = @transform_1, window_bounds = array<i64: 4, 128>}, {pipeline_mode = #tpu.pipeline_mode<synchronous>, transform_indices = @transform_2, window_bounds = array<i64: 2, 128>}, {transform_indices = @transform_3, window_bounds = array<i64: 1, 128, 128>}]} {
    %c8_i32 = arith.constant 8 : i32
    %0 = arith.muli %arg1, %c8_i32 : i32
    %1 = tpu.assume_multiple %0, 8 : i32
    %c0 = arith.constant 0 : index
    %2 = arith.index_cast %1 : i32 to index
    %c0_0 = arith.constant 0 : index
    %c0_1 = arith.constant 0 : index
    %3 = vector.load %arg2[%c0, %2, %c0_0, %c0_1] : memref<1x16x16x4xf32, #tpu.memory_space<vmem>>, vector<1x8x16x4xf32>
    %4 = vector.shape_cast %3 : vector<1x8x16x4xf32> to vector<8x16x4xf32>
    %c1_i32 = arith.constant 1 : i32
    %5 = arith.subi %1, %c1_i32 : i32
    %c0_i32 = arith.constant 0 : i32
    %6 = arith.maxsi %5, %c0_i32 : i32
    %c0_2 = arith.constant 0 : index
    %7 = arith.index_cast %6 : i32 to index
    %c0_3 = arith.constant 0 : index
    %c0_4 = arith.constant 0 : index
    %8 = vector.load %arg2[%c0_2, %7, %c0_3, %c0_4] : memref<1x16x16x4xf32, #tpu.memory_space<vmem>>, vector<1x1x16x4xf32>
    %9 = vector.shape_cast %8 : vector<1x1x16x4xf32> to vector<16x4xf32>
    %c8_i32_5 = arith.constant 8 : i32
    %10 = arith.addi %1, %c8_i32_5 : i32
    %c15_i32 = arith.constant 15 : i32
    %11 = arith.minsi %10, %c15_i32 : i32
    %c0_6 = arith.constant 0 : index
    %12 = arith.index_cast %11 : i32 to index
    %c0_7 = arith.constant 0 : index
    %c0_8 = arith.constant 0 : index
    %13 = vector.load %arg2[%c0_6, %12, %c0_7, %c0_8] : memref<1x16x16x4xf32, #tpu.memory_space<vmem>>, vector<1x1x16x4xf32>
    %14 = vector.shape_cast %13 : vector<1x1x16x4xf32> to vector<16x4xf32>
    %c0_i32_9 = arith.constant 0 : i32
    %15 = arith.cmpi eq, %arg1, %c0_i32_9 : i32
    %cst = arith.constant 0.000000e+00 : f32
    %16 = vector.broadcast %cst : f32 to vector<16x4xf32>
    %17 = arith.select %15, %16, %9 : vector<16x4xf32>
    %c1_i32_10 = arith.constant 1 : i32
    %18 = arith.cmpi eq, %arg1, %c1_i32_10 : i32
    %cst_11 = arith.constant 0.000000e+00 : f32
    %19 = vector.broadcast %cst_11 : f32 to vector<16x4xf32>
    %20 = arith.select %18, %19, %14 : vector<16x4xf32>
    %21 = vector.shape_cast %17 : vector<16x4xf32> to vector<1x16x4xf32>
    %22 = vector.extract_strided_slice %4 {offsets = [0, 0, 0], sizes = [7, 16, 4], strides = [1, 1, 1]} : vector<8x16x4xf32> to vector<7x16x4xf32>
    %23 = tpu.concatenate %21, %22 in 0 : vector<1x16x4xf32>, vector<7x16x4xf32> -> vector<8x16x4xf32>
    %24 = vector.extract_strided_slice %4 {offsets = [1, 0, 0], sizes = [7, 16, 4], strides = [1, 1, 1]} : vector<8x16x4xf32> to vector<7x16x4xf32>
    %25 = vector.shape_cast %20 : vector<16x4xf32> to vector<1x16x4xf32>
    %26 = tpu.concatenate %24, %25 in 0 : vector<7x16x4xf32>, vector<1x16x4xf32> -> vector<8x16x4xf32>
    %27 = arith.addf %23, %4 : vector<8x16x4xf32>
    %28 = arith.addf %27, %26 : vector<8x16x4xf32>
    %c1_i32_12 = arith.constant 1 : i32
    %29 = tpu.dynamic_rotate %28 by %c1_i32_12 dim 1 : vector<8x16x4xf32>, i32 -> vector<8x16x4xf32>
    %c15_i32_13 = arith.constant 15 : i32
    %30 = tpu.dynamic_rotate %28 by %c15_i32_13 dim 1 : vector<8x16x4xf32>, i32 -> vector<8x16x4xf32>
    %31 = arith.addf %28, %29 : vector<8x16x4xf32>
    %32 = arith.addf %31, %30 : vector<8x16x4xf32>
    %33 = vector.extract_strided_slice %28 {offsets = [0, 0, 0], sizes = [8, 1, 4], strides = [1, 1, 1]} : vector<8x16x4xf32> to vector<8x1x4xf32>
    %34 = vector.extract_strided_slice %28 {offsets = [0, 1, 0], sizes = [8, 1, 4], strides = [1, 1, 1]} : vector<8x16x4xf32> to vector<8x1x4xf32>
    %35 = arith.addf %33, %34 : vector<8x1x4xf32>
    %36 = vector.extract_strided_slice %28 {offsets = [0, 14, 0], sizes = [8, 1, 4], strides = [1, 1, 1]} : vector<8x16x4xf32> to vector<8x1x4xf32>
    %37 = vector.extract_strided_slice %28 {offsets = [0, 15, 0], sizes = [8, 1, 4], strides = [1, 1, 1]} : vector<8x16x4xf32> to vector<8x1x4xf32>
    %38 = arith.addf %36, %37 : vector<8x1x4xf32>
    %39 = tpu.iota {dimensions = array<i32: 1>} : vector<8x16x4xi32>
    %c0_i32_14 = arith.constant 0 : i32
    %40 = vector.broadcast %c0_i32_14 : i32 to vector<8x16x4xi32>
    %41 = arith.cmpi eq, %39, %40 : vector<8x16x4xi32>
    %c15_i32_15 = arith.constant 15 : i32
    %42 = vector.broadcast %c15_i32_15 : i32 to vector<8x16x4xi32>
    %43 = arith.cmpi eq, %39, %42 : vector<8x16x4xi32>
    %44 = vector.shape_cast %38 : vector<8x1x4xf32> to vector<8x1x4xf32>
    %45 = vector.broadcast %44 : vector<8x1x4xf32> to vector<8x16x4xf32>
    %46 = arith.select %43, %45, %32 : vector<8x16x4xi1>, vector<8x16x4xf32>
    %47 = vector.shape_cast %35 : vector<8x1x4xf32> to vector<8x1x4xf32>
    %48 = vector.broadcast %47 : vector<8x1x4xf32> to vector<8x16x4xf32>
    %49 = arith.select %41, %48, %46 : vector<8x16x4xi1>, vector<8x16x4xf32>
    %50 = vector.shape_cast %49 : vector<8x16x4xf32> to vector<128x4xf32>
    %c0_16 = arith.constant 0 : index
    %c0_17 = arith.constant 0 : index
    %51 = vector.load %arg3[%c0_16, %c0_17] : memref<4x128xf32, #tpu.memory_space<vmem>>, vector<4x128xf32>
    %cst_18 = arith.constant dense<0.000000e+00> : vector<128x128xf32>
    %52 = tpu.matmul %50, %51, %cst_18 {dimension_numbers = #tpu.dot_dimension_numbers<[1], [0], [0], [1], [0, 0, 1, 1], [], []>} : vector<128x4xf32>, vector<4x128xf32>, vector<128x128xf32> -> vector<128x128xf32>
    %c0_19 = arith.constant 0 : index
    %c0_20 = arith.constant 0 : index
    %53 = vector.load %arg4[%c0_19, %c0_20] : memref<2x128xf32, #tpu.memory_space<vmem>>, vector<2x128xf32>
    %54 = vector.extract_strided_slice %53 {offsets = [0, 0], sizes = [1, 128], strides = [1, 1]} : vector<2x128xf32> to vector<1x128xf32>
    %55 = vector.broadcast %54 : vector<1x128xf32> to vector<128x128xf32>
    %56 = arith.mulf %52, %55 : vector<128x128xf32>
    %57 = vector.extract_strided_slice %53 {offsets = [1, 0], sizes = [1, 128], strides = [1, 1]} : vector<2x128xf32> to vector<1x128xf32>
    %58 = vector.broadcast %57 : vector<1x128xf32> to vector<128x128xf32>
    %59 = arith.addf %56, %58 : vector<128x128xf32>
    %cst_21 = arith.constant 0.000000e+00 : f32
    %60 = vector.broadcast %cst_21 : f32 to vector<128x128xf32>
    %61 = arith.maximumf %59, %60 : vector<128x128xf32>
    %c0_22 = arith.constant 0 : index
    %c0_23 = arith.constant 0 : index
    %c0_24 = arith.constant 0 : index
    %62 = vector.load %arg5[%c0_22, %c0_23, %c0_24] : memref<1x128x128xf32, #tpu.memory_space<vmem>>, vector<1x128x128xf32>
    %63 = vector.shape_cast %62 : vector<1x128x128xf32> to vector<128x128xf32>
    %64 = vector.shape_cast %61 : vector<128x128xf32> to vector<1x128x128xf32>
    tpu.vector_store %arg5[%c0_22, %c0_23, %c0_24], %64 {strides = array<i32>} : memref<1x128x128xf32, #tpu.memory_space<vmem>>, vector<1x128x128xf32>,
    return
  }
  func.func @transform_0(%arg0: i32, %arg1: i32) -> (i32, i32, i32, i32) {
    %c0_i32 = arith.constant 0 : i32
    %c0_i32_0 = arith.constant 0 : i32
    %c0_i32_1 = arith.constant 0 : i32
    %c0_i32_2 = arith.constant 0 : i32
    return %arg0, %c0_i32, %c0_i32_0, %c0_i32_1 : i32, i32, i32, i32
  }
  func.func @transform_1(%arg0: i32, %arg1: i32) -> (i32, i32) {
    %c0_i32 = arith.constant 0 : i32
    %c0_i32_0 = arith.constant 0 : i32
    %c0_i32_1 = arith.constant 0 : i32
    return %c0_i32, %c0_i32_0 : i32, i32
  }
  func.func @transform_2(%arg0: i32, %arg1: i32) -> (i32, i32) {
    %c0_i32 = arith.constant 0 : i32
    %c0_i32_0 = arith.constant 0 : i32
    %c0_i32_1 = arith.constant 0 : i32
    return %c0_i32, %c0_i32_0 : i32, i32
  }
  func.func @transform_3(%arg0: i32, %arg1: i32) -> (i32, i32, i32) {
    %c0_i32 = arith.constant 0 : i32
    %c0_i32_0 = arith.constant 0 : i32
    return %arg0, %arg1, %c0_i32 : i32, i32, i32
  }
}

</mosaic_0001>

<bundles_post_ra>
// kernel: tpu_custom_call.1
= control target key start
LH: loop header
LB: loop body
LE: loop exit
PB: predicated region body
PF: predicated region fallthrough
CT: control target
= control target key end

     0   :  { %8 = vsyncpa [#allocation3], 0  ;;  %s1662_s0 = inlined_call_operand.vmem [shape: f32[2,16,16,4], index: 0, kind: input, shape index: {}]   ;;  %s1663_s1 = inlined_call_operand.vmem [shape: f32[4,128], index: 1, kind: input, shape index: {}]   ;;  %s1664_s2 = inlined_call_operand.vmem [shape: f32[2,128], index: 2, kind: input, shape index: {}]   ;;  %s1665_s3 = inlined_call_operand.hbm [shape: f32[2,256,128], index: 3, kind: output, shape index: {}]  }
   0x1   :  { %10 = vsyncpa [#allocation3 + $0x1], 0  ;;  %s1183_s12 = smov 0   ;;  %s1185_s13 = smov 0  }
   0x2   :  { %s1187_s14 = smov 0   ;;  %s1189_s15 = smov 0  }
   0x3   :  { %s1191_s16 = smov 0   ;;  %s1193_s17 = smov 0  }
   0x4   :  { %s1195_s18 = smov 0   ;;  %s1197_s19 = smov 0  }
   0x5 LB: > { %s896_s20 = sadd.s32 4294967295, %s1158_s19   ;;  %s897_s21 = sadd.s32 4294967294, %s1158_s19   ;;  %s1158_s19 = sphi %s1197_s19, %s16_s19   ;;  %s1154_s18 = sphi %s1195_s18, %s1674_s18   ;;  %s1150_s17 = sphi %s1193_s17, %s1673_s17   ;;  %s1146_s16 = sphi %s1191_s16, %s1672_s16   ;;  %s1142_s15 = sphi %s1189_s15, %s1671_s15   ;;  %s1138_s14 = sphi %s1187_s14, %s1670_s14   ;;  %s1134_s13 = sphi %s1185_s13, %s1669_s13   ;;  %s1130_s12 = sphi %s1183_s12, %s1668_s12  }
   0x6   : > { %s25_s22 = sadd.s32 1, %s1150_s17  ;;  %s28_s23 = sadd.s32 1, %s1154_s18 }
   0x7   : > { %p26_p0 = scmp.ge.s32.totalorder %s25_s22, 2  ;;  %p115_p1 = scmp.ne.s32.totalorder %s1138_s14, %s1134_s13 }
   0x8   : > { %p116_p2 = scmp.eq.s32.totalorder %s896_s20, 3  ;;  %p121_p5 = scmp.ne.s32.totalorder %s1134_s13, %s1130_s12 }
   0x9   : > { %s1676_s22 = smov (%p26_p0, %s25_s22), 0  ;;  %s1678_s23 = smov (!%p26_p0, %s28_s23), %s1154_s18 }
   0xa   : > { %s101_s24 = ssub.s32 %s1150_s17, %s1676_s22  ;;  %p1234_p3 = por %p116_p2, %p115_p1 }
   0xb   : > { %p30_p4 = scmp.ge.s32.totalorder %s1678_s23, 2  ;;  %p122_p6 = scmp.eq.s32.totalorder %s897_s21, 3 }
   0xc   : > { %p900_p7 = scmp.ge.s32.totalorder %s1158_s19, 1  ;;  %p154_p9 = scmp.lt.s32.totalorder %s1158_s19, 5 }
   0xd   : > { %s1680_s23 = smov (%p30_p4, %s1678_s23), 0  ;;  %p1243_p8 = por %p122_p6, %p121_p5 }
   0xe   : > { %s100_s27 = ssub.s32 %s1154_s18, %s1680_s23  ;;  %s105_s28 = sadd.s32 1, %s1138_s14 }
   0xf   : > { %s102_s29 = sor.u32 %s101_s24, %s100_s27  ;;  %p155_p10 = pnand %p900_p7, %p154_p9 }
  0x10   : > { %p103_p11 = scmp.eq.s32.totalorder %s102_s29, 0  ;;  %v526_v0 = vld [vmem:[%s1663_s1] sm:$0xf] (!%p155_p10)  ;;  %vm576_vm0 = vcmask (!%p155_p10), 1043456   ;;  %p178_p12 = scmp.lt.s32.totalorder (!%p155_p10), %s1146_s16, 1  ;;  %v277_v1 = vlaneseq (!%p155_p10)  ;;  %vm527_vm4 = vcmask (!%p155_p10), 31744  }
  0x11   : > { %158 = sbr.rel (%p155_p10) target bundleno = 313 (0x139), region = 32  ;;  %977 = vmatprep.subr.msk.mxu1 (!%p155_p10), %vm576_vm0, %v526_v0  ;;  %951 = vmatprep.subr.msk.mxu0 (!%p155_p10), %vm576_vm0, %v526_v0  ;;  %s933_s6 = sshll.u32 (!%p155_p10), %s1142_s15, 7 }
  0x12   : > { %s1252_s30 = scalar_select %p103_p11, %s1138_s14, %s105_s28  }
  0x13   : > { %s904_s7 = sshll.u32 (!%p155_p10), %s1142_s15, 3  ;;  %978 = vmatpush3.msk.msra.mxu1 (!%p155_p10), %vm576_vm0, %v526_v0  ;;  %952 = vmatpush3.msk.msra.mxu0 (!%p155_p10), %vm576_vm0, %v526_v0  ;;  %v1261_v2 = vshrl.u32 (!%p155_p10), %v277_v1, 7  ;;  %p217_p13 = scmp.eq.s32.totalorder (!%p155_p10), %s1142_s15, 0 }
  0x14   : > { %s906_s9 = sadd.s32 (!%p155_p10), 4294967295, %s904_s7  ;;  %s1373_s4 = sadd.s32 (!%p155_p10), 8, %s904_s7 }
  0x15   : > { %p204_p0 = scmp.gt.s32.totalorder (!%p155_p10), %s906_s9, 0  ;;  %v1275_v3 = vadd.s32 (!%p155_p10), 8, %v1261_v2  ;;  %vm279_vm1 = vcmp.lt.s32.totalorder (!%p155_p10), %v1261_v2, 1  ;;  %vm312_vm2 = vcmp.lt.s32.totalorder (!%p155_p10), %v1261_v2, 7  ;;  %v1296_v11 = vsub.s32 (!%p155_p10), 0, %v1261_v2  ;;  %p211_p1 = scmp.lt.s32.totalorder (!%p155_p10), %s1373_s4, 15 }
  0x16   : > { %vm426_vm3 = vcmp.eq.s32.totalorder (!%p155_p10), %v1261_v2, 0  ;;  %v1311_v18 = vsub.s32 (!%p155_p10), 6, %v1261_v2  ;;  %p223_p2 = scmp.eq.s32.totalorder (!%p155_p10), %s1142_s15, 1 }
  0x17   : > { %vm429_vm5 = vcmp.eq.s32.totalorder (!%p155_p10), %v1275_v3, 15 }
  0x18   : > { %s179_s8 = scalar_select %p178_p12, %s1146_s16, 1 }
  0x19   : > { %s1682_s9 = smov (!%p204_p0, %s906_s9), 0  ;;  %s1684_s4 = smov (!%p211_p1, %s1373_s4), 15 }
  0x1a   : > { %s932_s10 = sshll.u32 %s179_s8, 8  ;;  %s907_s27 = sshll.u32 %s1682_s9, 4 }
  0x1b   : > { %s1269_s21 = scalar_lea.vmem %s1662_s0, %s932_s10  ;;  %s908_s5 = sshll.u32 %s1684_s4, 4 }
  0x1c   : > { %s1272_s24 = scalar_lea.vmem %s1269_s21, %s933_s6  ;;  %s207_s28 = scalar_lea.vmem %s1269_s21, %s907_s27 }
  0x1d   : > { %v1278_v4 = vld [vmem:[%s1272_s24 + $0x30] sm:$0xff]  ;;  %v1281_v5 = vld [vmem:[%s1272_s24 + $0x38] sm:$0xff]  ;;  %v1284_v6 = vld [vmem:[%s1272_s24 + $0x40] sm:$0xff]  ;;  %s1053_s29 = scalar_select %p217_p13, 0, 255 }
  0x1e   : > { %v1289_v7 = vld [vmem:[%s1272_s24 + $0x48] sm:$0xff]  ;;  %v197_v8 = vld [vmem:[%s1272_s24 + $0x50] sm:$0xff]  ;;  %v198_v9 = vld [vmem:[%s1272_s24 + $0x58] sm:$0xff]  ;;  %v237_v10 = vadd.f32 %v1284_v6, %v1278_v4  ;;  %s214_s6 = scalar_lea.vmem %s1269_s21, %s908_s5  ;;  %s175_s10 = sand.u32 1, %s1134_s13  }
  0x1f   : > { %v1299_v12 = vld [vmem:[%s1272_s24 + $0x60] sm:$0xff]  ;;  %v1302_v13 = vld [vmem:[%s1272_s24 + $0x68] sm:$0xff]  ;;  %v238_v14 = vadd.f32 %v1289_v7, %v1281_v5  ;;  %v239_v15 = vadd.f32 %v197_v8, %v1284_v6  ;;  %v240_v16 = vadd.f32 %v198_v9, %v1289_v7  ;;  %v189_v23 = vld [vmem:[%s1272_s24 + $0x10] sm:$0xff]  ;;  %s1059_s7 = scalar_select %p223_p2, 0, 255 }
  0x20   : > { %v187_v17 = vld [vmem:[%s1272_s24] sm:$0xff]  ;;  %v241_v19 = vadd.f32 %v1299_v12, %v197_v8  ;;  %v1315_v20 = vadd.f32 %v1302_v13, %v198_v9  ;;  %v253_v21 = vadd.f32 %v237_v10, %v197_v8  ;;  %v188_v22 = vld [vmem:[%s1272_s24 + $0x8] sm:$0xff]  ;;  %v190_v24 = vld [vmem:[%s1272_s24 + $0x18] sm:$0xff]  ;;  %s901_s11 = sshll.u32 %s175_s10, 7  ;;  %s927_s21 = sshll.u32 %s1142_s15, 4 }
  0x21   : > { %v254_v25 = vadd.f32 %v238_v14, %v198_v9  ;;  %v1322_v26 = vld [vmem:[%s1272_s24 + $0x20] sm:$0xff]  ;;  %v1325_v27 = vld [vmem:[%s1272_s24 + $0x28] sm:$0xff]  ;;  %v231_v28 = vadd.f32 %v189_v23, %v187_v17  ;;  %v232_v29 = vadd.f32 %v190_v24, %v188_v22  ;;  %v1329_v30 = vld [vmem:[%s1272_s24 + $0x70] sm:$0xff]  ;;  %v1340_v37 = vadd.f32 %v239_v15, %v1299_v12  ;;  %s1552_s20 = scalar_lea.vmem [#allocation2], %s901_s11  ;;  %s1610_s5 = scalar_lea.sflag [#allocation3], %s175_s10 }
  0x22   : > { %v265_v31 = vrot.slane %v253_v21, 7  ;;  %v300_v32 = vrot.slane %v253_v21, 1  ;;  %v1334_v33 = vadd.f32 %v1322_v26, %v189_v23  ;;  %v1337_v34 = vadd.f32 %v1325_v27, %v190_v24  ;;  %v1054_v40 = vld [vmem:[%s207_s28] sm:%s1053_s29]  ;;  %v1057_v46 = vld [vmem:[%s207_s28 + $0x8] sm:%s1053_s29] }
  0x23   : > { %v273_v35 = vrot.slane %v254_v25, 7  ;;  %v308_v36 = vrot.slane %v254_v25, 1  ;;  %v1343_v38 = vadd.f32 %v240_v16, %v1302_v13  ;;  %v1346_v41 = vadd.f32 %v231_v28, %v1322_v26 }
  0x24   : > { %v389_v39 = vadd.f32 %v300_v32, %v253_v21  ;;  %v1349_v42 = vadd.f32 %v232_v29, %v1325_v27  ;;  %v1352_v43 = vadd.f32 %v241_v19, %v1329_v30  ;;  %v229_v47 = vadd.f32 %v1054_v40, %v187_v17 }
  0x25   : > { %v292_v44 = vsel %vm279_vm1, %v273_v35, %v265_v31  ;;  %v317_v45 = vsel %vm312_vm2, %v300_v32, %v308_v36  ;;  %v284_v48 = vsel %vm279_vm1, %v265_v31, %v273_v35  ;;  %v230_v51 = vadd.f32 %v1057_v46, %v188_v22 }
  0x26   : > { %v337_v49 = vadd.f32 %v292_v44, %v253_v21  ;;  %v497_v50 = vrot.slane %v389_v39, %v1296_v11  ;;  %v325_v52 = vsel %vm312_vm2, %v308_v36, %v300_v32  ;;  %v245_v53 = vadd.f32 %v229_v47, %v189_v23 }
  0x27   : > { %v338_v54 = vadd.f32 %v284_v48, %v254_v25  ;;  %v421_v55 = vadd.f32 %v308_v36, %v254_v25  ;;  %v266_v56 = vrot.slane %v1340_v37, 7  ;;  %v246_v58 = vadd.f32 %v230_v51, %v190_v24 }
  0x28   : > { %v353_v57 = vadd.f32 %v337_v49, %v317_v45  ;;  %v274_v59 = vrot.slane %v1343_v38, 7  ;;  %v301_v60 = vrot.slane %v1340_v37, 1  ;;  %v261_v61 = vrot.slane %v245_v53, 7 }
  0x29   : > { %v296_v62 = vrot.slane %v245_v53, 1  ;;  %v354_v63 = vadd.f32 %v338_v54, %v325_v52  ;;  %v449_v0 = vrot.slane %v421_v55, %v1311_v18  ;;  %v269_v8 = vrot.slane %v246_v58, 7 }
  0x2a   : > { %v518_v1 = vsel %vm426_vm3, %v497_v50, %v353_v57  ;;  %v304_v9 = vrot.slane %v246_v58, 1  ;;  %v293_v10 = vsel %vm279_vm1, %v274_v59, %v266_v56  ;;  %v309_v16 = vrot.slane %v1343_v38, 1 }
  0x2b   : > { %965 = vmatprep.mubr.msk.f32.mxu1 %vm527_vm4, %v518_v1  ;;  %v385_v14 = vadd.f32 %v296_v62, %v245_v53  ;;  %v471_v15 = vsel %vm429_vm5, %v449_v0, %v354_v63  ;;  %v339_v17 = vadd.f32 %v293_v10, %v1340_v37  ;;  %v288_v19 = vsel %vm279_vm1, %v269_v8, %v261_v61 }
  0x2c   : > { %v313_v21 = vsel %vm312_vm2, %v296_v62, %v304_v9  ;;  %966 = vmatmul.mubr.msk.f32.vlgmr.msra.gmra.mrb[0].mxu1 %vm527_vm4, %v471_v15  ;;  %v280_v22 = vsel %vm279_vm1, %v261_v61, %v269_v8  ;;  %v321_v23 = vsel %vm312_vm2, %v304_v9, %v296_v62  ;;  %v329_v24 = vadd.f32 %v288_v19, %v245_v53 }
  0x2d   : > { %v481_v25 = vrot.slane %v385_v14, %v1296_v11  ;;  %v330_v28 = vadd.f32 %v280_v22, %v246_v58  ;;  %v417_v29 = vadd.f32 %v304_v9, %v246_v58  ;;  %v318_v31 = vsel %vm312_vm2, %v301_v60, %v309_v16  ;;  %v1424_v58 = vld [vmem:[%s1272_s24 + $0x78] sm:$0xff]  ;;  %s928_s24 = sshll.u32 %s1146_s16, 5  ;;  %s814_s16 = sshll.u32 %s1552_s20, 4  ;;  %s1603_s16 = int_to_ptr.vmem [resolvable:$true] %s814_s16 }
  0x2e   : > { %v390_v32 = vadd.f32 %v301_v60, %v1340_v37  ;;  %v262_v35 = vrot.slane %v1346_v41, 7  ;;  %v270_v36 = vrot.slane %v1349_v42, 7  ;;  %v345_v39 = vadd.f32 %v329_v24, %v313_v21  ;;  %s811_s27 = sadd.s32 %s928_s24, %s927_s21 }
  0x2f   : > { %v346_v40 = vadd.f32 %v330_v28, %v321_v23  ;;  %v433_v44 = vrot.slane %v417_v29, %v1311_v18  ;;  %v355_v45 = vadd.f32 %v339_v17, %v318_v31  ;;  %v297_v37 = vrot.slane %v1346_v41, 1  ;;  %s929_s15 = sshll.u32 %s811_s27, 7 }
  0x30   : > { %v501_v46 = vrot.slane %v390_v32, %v1296_v11  ;;  %v289_v47 = vsel %vm279_vm1, %v270_v36, %v262_v35  ;;  %v305_v48 = vrot.slane %v1349_v42, 1  ;;  %v510_v49 = vsel %vm426_vm3, %v481_v25, %v345_v39  ;;  %s1601_s4 = scalar_lea.hbm %s1665_s3, %s929_s15 }
  0x31   : > { %v463_v50 = vsel %vm429_vm5, %v433_v44, %v346_v40  ;;  %v331_v51 = vadd.f32 %v289_v47, %v1346_v41  ;;  %v285_v52 = vsel %vm279_vm1, %v266_v56, %v274_v59  ;;  %953 = vmatprep.mubr.msk.f32.mxu0 %vm527_vm4, %v510_v49  ;;  %v386_v55 = vadd.f32 %v297_v37, %v1346_v41 }
  0x32   : > { %v520_v53 = vsel %vm426_vm3, %v501_v46, %v355_v45  ;;  %v314_v54 = vsel %vm312_vm2, %v297_v37, %v305_v48  ;;  %v326_v57 = vsel %vm312_vm2, %v309_v16, %v301_v60  ;;  %954 = vmatmul.mubr.msk.f32.vlgmr.msra.gmra.mrb[0].mxu0 %vm527_vm4, %v463_v50  ;;  %v340_v59 = vadd.f32 %v285_v52, %v1343_v38 }
  0x33   : > { %968 = vmatprep.mubr.msk.f32.mxu1 %vm527_vm4, %v520_v53  ;;  %v347_v56 = vadd.f32 %v331_v51, %v314_v54  ;;  %v422_v61 = vadd.f32 %v309_v16, %v1343_v38  ;;  %v267_v62 = vrot.slane %v1352_v43, 7  ;;  %v485_v63 = vrot.slane %v386_v55, %v1296_v11  ;;  %v1060_v55 = vld [vmem:[%s214_s6] sm:%s1059_s7] }
  0x34   : > { %v281_v41 = vsel %vm279_vm1, %v262_v35, %v270_v36  ;;  %v322_v60 = vsel %vm312_vm2, %v305_v48, %v297_v37  ;;  %v418_v0 = vadd.f32 %v305_v48, %v1349_v42  ;;  %v356_v1 = vadd.f32 %v340_v59, %v326_v57  ;;  %v1063_v59 = vld [vmem:[%s214_s6 + $0x8] sm:%s1059_s7]  ;;  %s1064_s6 = scalar_lea.vmem %s1603_s16, 2048  ;;  %s1160_s7 = smov [#allocation2]  }
  0x35   : > { %v453_v8 = vrot.slane %v422_v61, %v1311_v18  ;;  %v332_v9 = vadd.f32 %v281_v41, %v1349_v42  ;;  %v258_v38 = vadd.f32 %v1315_v20, %v1424_v58  ;;  %v512_v10 = vsel %vm426_vm3, %v485_v63, %v347_v56  ;;  %p1065_p4 = scmp.ne.s32.totalorder %s1603_s16, %s1064_s6  ;;  %s1068_s8 = sshll.u32 %s1160_s7, 4  ;;  %s1069_s8 = int_to_ptr.vmem [resolvable:$false] %s1068_s8 }
  0x36   : > { %v437_v14 = vrot.slane %v418_v0, %v1311_v18  ;;  %v302_v15 = vrot.slane %v1352_v43, 1  ;;  %v249_v16 = vadd.f32 %v1334_v33, %v1278_v4  ;;  %956 = vmatprep.mubr.msk.f32.mxu0 %vm527_vm4, %v512_v10  ;;  %v250_v22 = vadd.f32 %v1337_v34, %v1281_v5  ;;  %s1070_s9 = scalar_lea.vmem %s1069_s8, 4096  ;;  %p1071_p7 = scmp.lt.s32.totalorder %s1603_s16, %s1069_s8 }
  0x37   : > { %v473_v42 = vsel %vm429_vm5, %v453_v8, %v356_v1  ;;  %v348_v17 = vadd.f32 %v332_v9, %v322_v60  ;;  %v275_v19 = vrot.slane %v258_v38, 7  ;;  %v310_v20 = vrot.slane %v258_v38, 1  ;;  %p1066_p5 = pnand %p1065_p4, %p1234_p3  ;;  %p1072_p9 = scmp.lt.s32.totalorder %s1070_s9, %s1064_s6 }
  0x38   : > { %969 = vmatmul.mubr.msk.f32.gmra.mrb[2].mxu1 %vm527_vm4, %v473_v42  ;;  %v391_v21 = vadd.f32 %v302_v15, %v1352_v43  ;;  %v263_v23 = vrot.slane %v249_v16, 7  ;;  %v298_v33 = vrot.slane %v249_v16, 1  ;;  %v271_v32 = vrot.slane %v250_v22, 7 }
  0x39   : > { %v465_v24 = vsel %vm429_vm5, %v437_v14, %v348_v17  ;;  %v294_v25 = vsel %vm279_vm1, %v275_v19, %v267_v62  ;;  %v319_v28 = vsel %vm312_vm2, %v302_v15, %v310_v20  ;;  %v286_v29 = vsel %vm279_vm1, %v267_v62, %v275_v19  ;;  %p1067_p6 = pneg %p1066_p5  ;;  %p1073_p10 = por %p1072_p9, %p1071_p7 }
  0x3a   : > { %957 = vmatmul.mubr.msk.f32.gmra.mrb[2].mxu0 %vm527_vm4, %v465_v24  ;;  %v341_v31 = vadd.f32 %v294_v25, %v1352_v43  ;;  %v505_v34 = vrot.slane %v391_v21, %v1296_v11  ;;  %v306_v35 = vrot.slane %v250_v22, 1  ;;  %v387_v36 = vadd.f32 %v298_v33, %v249_v16 }
  0x3b   : > { %v327_v39 = vsel %vm312_vm2, %v310_v20, %v302_v15  ;;  %v342_v40 = vadd.f32 %v286_v29, %v258_v38  ;;  %v423_v44 = vadd.f32 %v310_v20, %v258_v38  ;;  %v290_v46 = vsel %vm279_vm1, %v271_v32, %v263_v23  ;;  %p1074_p11 = pnand %p1073_p10, %p1067_p6 }
  0x3c   : > { %v357_v45 = vadd.f32 %v341_v31, %v319_v28  ;;  %v315_v47 = vsel %vm312_vm2, %v298_v33, %v306_v35  ;;  %v282_v43 = vsel %vm279_vm1, %v263_v23, %v271_v32  ;;  %v333_v37 = vadd.f32 %v290_v46, %v249_v16 }
  0x3d   : > { %v489_v48 = vrot.slane %v387_v36, %v1296_v11  ;;  %v358_v49 = vadd.f32 %v342_v40, %v327_v39  ;;  %v457_v50 = vrot.slane %v423_v44, %v1311_v18  ;;  %v323_v52 = vsel %vm312_vm2, %v306_v35, %v298_v33 }
  0x3e   : > { %v522_v51 = vsel %vm426_vm3, %v505_v34, %v357_v45  ;;  %v334_v53 = vadd.f32 %v282_v43, %v250_v22  ;;  %v419_v54 = vadd.f32 %v306_v35, %v250_v22  ;;  %v349_v57 = vadd.f32 %v333_v37, %v315_v47  ;;  %v725_v37 = vld [vmem:[%s1664_s2] sm:$0x3] }
  0x3f   : > { %971 = vmatprep.mubr.msk.f32.mxu1 %vm527_vm4, %v522_v51  ;;  %v475_v56 = vsel %vm429_vm5, %v457_v50, %v358_v49  ;;  %v243_v61 = vadd.f32 %v1329_v30, %v1299_v12  ;;  %v244_v41 = vadd.f32 %v1424_v58, %v1302_v13  ;;  %v235_v1 = vadd.f32 %v1278_v4, %v1322_v26 }
  0x40   : > { %972 = vmatmul.mubr.msk.f32.gmra.mrb[4].mxu1 %vm527_vm4, %v475_v56  ;;  %v350_v62 = vadd.f32 %v334_v53, %v323_v52  ;;  %v441_v63 = vrot.slane %v419_v54, %v1311_v18  ;;  %v514_v60 = vsel %vm426_vm3, %v489_v48, %v349_v57  ;;  %v236_v8 = vadd.f32 %v1281_v5, %v1325_v27 }
  0x41   : > { %v259_v0 = vadd.f32 %v1060_v55, %v243_v61  ;;  %959 = vmatprep.mubr.msk.f32.mxu0 %vm527_vm4, %v514_v60  ;;  %v260_v30 = vadd.f32 %v1063_v59, %v244_v41  ;;  %v251_v58 = vadd.f32 %v235_v1, %v1284_v6  ;;  %v748_v48 = vsub.s32 1, %v1261_v2 }
  0x42   : > { %v467_v12 = vsel %vm429_vm5, %v441_v63, %v350_v62  ;;  %v252_v38 = vadd.f32 %v236_v8, %v1289_v7  ;;  %v1541_v49 = vrot.slane %v725_v37, %v1296_v11 }
  0x43   : > { %960 = vmatmul.mubr.msk.f32.gmra.mrb[4].mxu0 %vm527_vm4, %v467_v12  ;;  %v268_v9 = vrot.slane %v259_v0, 7  ;;  %v303_v13 = vrot.slane %v259_v0, 1  ;;  %v276_v10 = vrot.slane %v260_v30, 7  ;;  %v311_v14 = vrot.slane %v260_v30, 1 }
  0x44   : > { %v264_v26 = vrot.slane %v251_v58, 7  ;;  %v272_v15 = vrot.slane %v252_v38, 7  ;;  %v299_v5 = vrot.slane %v251_v58, 1  ;;  %v307_v42 = vrot.slane %v252_v38, 1 }
  0x45   : > { %v392_v4 = vadd.f32 %v303_v13, %v259_v0  ;;  %v295_v27 = vsel %vm279_vm1, %v276_v10, %v268_v9  ;;  %v320_v16 = vsel %vm312_vm2, %v303_v13, %v311_v14  ;;  %v287_v17 = vsel %vm279_vm1, %v268_v9, %v276_v10 }
  0x46   : > { %v343_v19 = vadd.f32 %v295_v27, %v259_v0  ;;  %v291_v7 = vsel %vm279_vm1, %v272_v15, %v264_v26  ;;  %v388_v20 = vadd.f32 %v299_v5, %v251_v58  ;;  %v316_v21 = vsel %vm312_vm2, %v299_v5, %v307_v42 }
  0x47   : > { %v509_v6 = vrot.slane %v392_v4, %v1296_v11  ;;  %v335_v22 = vadd.f32 %v291_v7, %v251_v58  ;;  %v328_v23 = vsel %vm312_vm2, %v311_v14, %v303_v13  ;;  %v344_v33 = vadd.f32 %v287_v17, %v260_v30 }
  0x48   : > { %v359_v24 = vadd.f32 %v343_v19, %v320_v16  ;;  %v493_v25 = vrot.slane %v388_v20, %v1296_v11  ;;  %v424_v28 = vadd.f32 %v311_v14, %v260_v30  ;;  %v283_v29 = vsel %vm279_vm1, %v264_v26, %v272_v15 }
  0x49   : > { %v351_v31 = vadd.f32 %v335_v22, %v316_v21  ;;  %v360_v34 = vadd.f32 %v344_v33, %v328_v23  ;;  %v324_v32 = vsel %vm312_vm2, %v307_v42, %v299_v5  ;;  %v336_v35 = vadd.f32 %v283_v29, %v252_v38 }
  0x4a   : > { %v524_v36 = vsel %vm426_vm3, %v509_v6, %v359_v24  ;;  %v461_v39 = vrot.slane %v424_v28, %v1311_v18  ;;  %v420_v40 = vadd.f32 %v307_v42, %v252_v38  ;;  %v1544_v50 = vrot.slane %v725_v37, %v748_v48 }
  0x4b   : > { %974 = vmatprep.mubr.msk.f32.mxu1 %vm527_vm4, %v524_v36  ;;  %v516_v44 = vsel %vm426_vm3, %v493_v25, %v351_v31  ;;  %v352_v45 = vadd.f32 %v336_v35, %v324_v32 }
  0x4c   : > { %962 = vmatprep.mubr.msk.f32.mxu0 %vm527_vm4, %v516_v44  ;;  %v477_v46 = vsel %vm429_vm5, %v461_v39, %v360_v34  ;;  %v445_v47 = vrot.slane %v420_v40, %v1311_v18 }
  0x4d   : > { %975 = vmatmul.mubr.msk.f32.gmra.mrb[6].mxu1 %vm527_vm4, %v477_v46 }
  0x4e   : > { %v469_v43 = vsel %vm429_vm5, %v445_v47, %v352_v45 }
  0x4f   : > { %963 = vmatmul.mubr.msk.f32.gmra.mrb[6].mxu0 %vm527_vm4, %v469_v43 }
  0xff   : > { %v967_v18 = vpop.f32.mrb[0].mxu1 }
 0x100   : > { %v739_v3 = vmul.f32 %v967_v18, %v1541_v49  ;;  %v686_v51 = vpop.f32.mrb[1].mxu1 }
 0x101   : > { %v738_v52 = vmul.f32 %v1541_v49, %v686_v51 }
 0x102   : > { %v759_v53 = vadd.f32 %v1544_v50, %v739_v3 }
 0x103   : > { %v758_v54 = vadd.f32 %v1544_v50, %v738_v52 }
 0x104   : > { %v775_v55 = vmax.f32 %v759_v53, 0.0 }
 0x105   : > { %v774_v2 = vmax.f32 %v758_v54, 0.0  ;;  %v955_v11 = vpop.f32.mrb[0].mxu0 }
 0x106   : > { %791 = vst [vmem:[%s1552_s20 + $0x48] sm:$0xff] %v775_v55  ;;  %v731_v57 = vmul.f32 %v955_v11, %v1541_v49  ;;  %v646_v56 = vpop.f32.mrb[1].mxu0 }
 0x107   : > { %790 = vst [vmem:[%s1552_s20 + $0x40] sm:$0xff] %v774_v2  ;;  %v730_v59 = vmul.f32 %v1541_v49, %v646_v56 }
 0x108   : > { %v751_v61 = vadd.f32 %v1544_v50, %v731_v57 }
 0x109   : > { %v750_v62 = vadd.f32 %v1544_v50, %v730_v59 }
 0x10a   : > { %v767_v63 = vmax.f32 %v751_v61, 0.0 }
 0x10b   : > { %v970_v41 = vpop.f32.mrb[2].mxu1  ;;  %v766_v60 = vmax.f32 %v750_v62, 0.0 }
 0x10c   : > { %v741_v0 = vmul.f32 %v970_v41, %v1541_v49  ;;  %v696_v1 = vpop.f32.mrb[3].mxu1  ;;  %783 = vst [vmem:[%s1552_s20 + $0x8] sm:$0xff] %v767_v63 }
 0x10d   : > { %v958_v8 = vpop.f32.mrb[2].mxu0  ;;  %v740_v12 = vmul.f32 %v1541_v49, %v696_v1  ;;  %782 = vst [vmem:[%s1552_s20] sm:$0xff] %v766_v60 }
 0x10e   : > { %v761_v30 = vadd.f32 %v1544_v50, %v741_v0  ;;  %v733_v9 = vmul.f32 %v958_v8, %v1541_v49  ;;  %v656_v13 = vpop.f32.mrb[3].mxu0 }
 0x10f   : > { %v760_v58 = vadd.f32 %v1544_v50, %v740_v12  ;;  %v732_v38 = vmul.f32 %v1541_v49, %v656_v13 }
 0x110   : > { %v777_v10 = vmax.f32 %v761_v30, 0.0  ;;  %v753_v14 = vadd.f32 %v1544_v50, %v733_v9 }
 0x111   : > { %v776_v4 = vmax.f32 %v760_v58, 0.0  ;;  %v752_v26 = vadd.f32 %v1544_v50, %v732_v38 }
 0x112   : > { %793 = vst [vmem:[%s1552_s20 + $0x58] sm:$0xff] %v777_v10  ;;  %v769_v15 = vmax.f32 %v753_v14, 0.0 }
 0x113   : > { %792 = vst [vmem:[%s1552_s20 + $0x50] sm:$0xff] %v776_v4  ;;  %v768_v5 = vmax.f32 %v752_v26, 0.0  ;;  %v973_v27 = vpop.f32.mrb[4].mxu1 }
 0x114   : > { %785 = vst [vmem:[%s1552_s20 + $0x18] sm:$0xff] %v769_v15  ;;  %v743_v16 = vmul.f32 %v973_v27, %v1541_v49  ;;  %v706_v42 = vpop.f32.mrb[5].mxu1 }
 0x115   : > { %784 = vst [vmem:[%s1552_s20 + $0x10] sm:$0xff] %v768_v5  ;;  %v742_v17 = vmul.f32 %v1541_v49, %v706_v42 }
 0x116   : > { %v763_v19 = vadd.f32 %v1544_v50, %v743_v16  ;;  %v961_v6 = vpop.f32.mrb[4].mxu0 }
 0x117   : > { %v735_v7 = vmul.f32 %v961_v6, %v1541_v49  ;;  %v762_v20 = vadd.f32 %v1544_v50, %v742_v17  ;;  %v666_v21 = vpop.f32.mrb[5].mxu0 }
 0x118   : > { %v779_v22 = vmax.f32 %v763_v19, 0.0  ;;  %v734_v23 = vmul.f32 %v1541_v49, %v666_v21 }
 0x119   : > { %v755_v33 = vadd.f32 %v1544_v50, %v735_v7  ;;  %v778_v24 = vmax.f32 %v762_v20, 0.0 }
 0x11a   : > { %795 = vst [vmem:[%s1552_s20 + $0x68] sm:$0xff] %v779_v22  ;;  %v754_v25 = vadd.f32 %v1544_v50, %v734_v23 }
 0x11b   : > { %v771_v28 = vmax.f32 %v755_v33, 0.0  ;;  %794 = vst [vmem:[%s1552_s20 + $0x60] sm:$0xff] %v778_v24 }
 0x11c   : > { %v770_v29 = vmax.f32 %v754_v25, 0.0 }
 0x11d   : > { %787 = vst [vmem:[%s1552_s20 + $0x28] sm:$0xff] %v771_v28 }
 0x11e   : > { %786 = vst [vmem:[%s1552_s20 + $0x20] sm:$0xff] %v770_v29 }
 0x120   : > { %v976_v31 = vpop.f32.mrb[6].mxu1 }
 0x121   : > { %v745_v34 = vmul.f32 %v976_v31, %v1541_v49  ;;  %v716_v32 = vpop.f32.mrb[7].mxu1 }
 0x122   : > { %v964_v35 = vpop.f32.mrb[6].mxu0  ;;  %v744_v36 = vmul.f32 %v1541_v49, %v716_v32 }
 0x123   : > { %v765_v39 = vadd.f32 %v1544_v50, %v745_v34  ;;  %v737_v40 = vmul.f32 %v964_v35, %v1541_v49  ;;  %v676_v44 = vpop.f32.mrb[7].mxu0 }
 0x124   : > { %v764_v45 = vadd.f32 %v1544_v50, %v744_v36  ;;  %v736_v46 = vmul.f32 %v1541_v49, %v676_v44 }
 0x125   : > { %v781_v47 = vmax.f32 %v765_v39, 0.0  ;;  %v757_v43 = vadd.f32 %v1544_v50, %v737_v40 }
 0x126   : > { %v780_v37 = vmax.f32 %v764_v45, 0.0  ;;  %v756_v48 = vadd.f32 %v1544_v50, %v736_v46 }
 0x127   : > { %797 = vst [vmem:[%s1552_s20 + $0x78] sm:$0xff] %v781_v47  ;;  %v773_v18 = vmax.f32 %v757_v43, 0.0 }
 0x128   : > { %796 = vst [vmem:[%s1552_s20 + $0x70] sm:$0xff] %v780_v37  ;;  %v772_v49 = vmax.f32 %v756_v48, 0.0 }
 0x129   : > { %789 = vst [vmem:[%s1552_s20 + $0x38] sm:$0xff] %v773_v18 }
 0x12a   : > { %788 = vst [vmem:[%s1552_s20 + $0x30] sm:$0xff] %v772_v49 }
 0x12b   : > { %1077 = shalt.err (!%p1074_p11)
}
 0x12c   : > { %s1078_s10 = scalar_lea.hbm %s1601_s4, 2048  ;;  %s1082_s21 = scalar_lea.hbm %s1665_s3, 8192 }
 0x12d   : > { %p1079_p12 = scmp.ne.s32.totalorder %s1601_s4, %s1078_s10  ;;  %p1083_p1 = scmp.lt.u32.totalorder %s1601_s4, %s1665_s3 }
 0x12e   : > { %p1084_p2 = scmp.lt.u32.totalorder %s1082_s21, %s1078_s10  ;;  %p1086_p5 = scmp.lt.u32.totalorder %s1078_s10, %s1601_s4 }
 0x12f   : > { %p1080_p13 = pnand %p1079_p12, %p1234_p3 }
 0x130   : > { %p1085_p4 = por %p1084_p2, %p1083_p1 }
 0x131   : > { %p1081_p0 = pneg %p1080_p13 }
 0x132   : > { %p1087_p6 = por %p1086_p5, %p1085_p4 }
 0x134   : > { %p1088_p7 = pnand %p1087_p6, %p1081_p0 }
 0x136   : > { %1091 = shalt.err (!%p1088_p7)
}
 0x137   : > { %s1161_s15 = smov 128   ;;  %s1162_s28 = smov 8  }
 0x138   : > { %979 = dma.vmem_to_hbm [thread:$0]  (%p1234_p3), %s1603_s16, 2048, %s1601_s4, %s1610_s5, %s1161_s15, %s1161_s15, %s1162_s28  }
 0x139 PF: > { %p985_p9 = scmp.ge.s32.totalorder %s1158_s19, 2  ;;  %s829_s29 = sand.u32 1, %s1130_s12  }
 0x13a   : > { %s830_s6 = scalar_lea.sflag [#allocation3], %s829_s29 }
 0x13b   : > { %p982_p10 = pnand %p985_p9, %p1243_p8 }
 0x13d   : > { %1125 = dma.done.wait (!%p982_p10), %s830_s6, 2048  }
 0x13e   : > { %1127 = vsyncadd (!%p982_p10), %s830_s6, 4294965248  ;;  %s16_s19 = sadd.s32 1, %s1158_s19   ;;  %s1668_s12 = smov %s1134_s13 }
 0x13f   : > { %p13_p11 = scmp.ge.s32.totalorder %s16_s19, 6   ;;  %s1669_s13 = smov %s1138_s14 }
 0x140   : > { %s1670_s14 = smov %s1252_s30  ;;  %s1671_s15 = smov %s1150_s17 }
 0x141   : > { %s1672_s16 = smov %s1154_s18  ;;  %s1673_s17 = smov %s1676_s22 }
 0x142   : > { %s1674_s18 = smov %s1680_s23  ;;  %15 = sbr.rel (!%p13_p11) target bundleno = 5 (0x5), region = 70 }
 0x149   :  { %835 = vsyncpa [#allocation3], 1 }
 0x14a   :  { %837 = vsyncpa [#allocation3 + $0x1], 1 }

</bundles_post_ra>
